<compile_context>
chip_gen: v7x
topology: tpu7x:2x2x1
jax: 0.10.0
libtpu: 0.0.40
codegen_flags: <defaults>
</compile_context>

<pallas_src>
import functools

import jax
import jax.numpy as jnp
from jax import lax
from jax.experimental import pallas as pl
from jax.experimental.pallas import tpu as pltpu


def spade_kernel(x_ref, mean_ref, rstd_ref, seg_ref, w1_ref, b1_ref,
                 wgb_ref, bgb_ref, colmask_ref, rowmask_ref, out_ref,
                 *, ks, W):
    # Per grid step (one batch element x one row tile):
    #   x_ref:       (1, Cn, THW)       f32   tile of the flattened input
    #   mean_ref:    (1, Cn, 1)         f32   hoisted instance-norm mean
    #   rstd_ref:    (1, Cn, 1)         f32   hoisted instance-norm 1/sqrt(var+eps)
    #   seg_ref:     (1, 1, Cl, LW)     bf16  halo'd seg tile (TH + 2*(2pw+2) rows)
    #   w1_ref:      (nh, ks*ks*Cl)     bf16  mlp_shared conv as a matrix
    #   b1_ref:      (nh, 1)            f32
    #   wgb_ref:     (ks*ks, 2Cn, nh)   bf16  per-tap fused gamma/beta weights
    #   bgb_ref:     (2Cn, 1)           f32
    #   colmask_ref: (ks, LA)           bf16  resident per-tap column masks
    #   rowmask_ref: (1, 1, LA)         f32   per-tile actv row-validity mask
    #   out_ref:     (1, Cn, THW)       f32
    pw = ks // 2
    Cn = x_ref.shape[1]
    THW = x_ref.shape[2]
    LA = colmask_ref.shape[1]      # lanes of the actv extent (TH + 2*pw + 2 rows)

    # ---- InstanceNorm2d(affine=False) with hoisted per-(n, c) statistics.
    normalized = (x_ref[0] - mean_ref[0]) * rstd_ref[0]          # (Cn, THW) f32

    seg = seg_ref[0, 0]                                          # (Cl, LW) bf16
    colmask = colmask_ref[...]                                   # (ks, LA) bf16

    # Tap window start inside the halo'd tile.  The halo is 2*pw + 2 rows per
    # side, so every (dy, dx) window below is an in-bounds static lane slice
    # (one cross-lane shift per tap; no padded copy, no wrap to mask).
    def tap_start(dy, dx):
        return (dy + 1) * W + (dx - pw)

    # ---- mlp_shared: 3x3 conv (label_nc -> nhidden) as ONE im2col MXU dot
    # (Cin is tiny so the patch matrix stays small), then bias + ReLU.
    pieces = []
    for dy in range(ks):
        for dx in range(ks):
            s0 = tap_start(dy, dx)
            piece = seg[:, s0:s0 + LA]                           # (Cl, LA) bf16
            if dx != pw:                                         # center column mask == 1
                piece = piece * colmask[dx:dx + 1, :]
            pieces.append(piece)
    patch = jnp.concatenate(pieces, axis=0)                      # (ks*ks*Cl, LA) bf16
    actv = jnp.dot(w1_ref[...], patch,
                   preferred_element_type=jnp.float32)           # (nh, LA) f32
    actv = jnp.maximum(actv + b1_ref[...], 0.0)
    # Zero actv rows outside the image: the gamma/beta convs must see zero
    # padding there, not ReLU(bias).  Then cast once to bf16 for the MXU.
    actv = (actv * rowmask_ref[0]).astype(jnp.bfloat16)          # (nh, LA) bf16

    # ---- mlp_gamma + mlp_beta fused: ks*ks per-tap MXU accumulates.
    # No (ks*ks*nh, HW) patch matrix is ever materialized.
    acc = jnp.zeros((wgb_ref.shape[1], THW), jnp.float32)        # (2Cn, THW)
    cmask_out = colmask[:, :THW]                                 # (ks, THW) bf16
    for dy in range(ks):
        for dx in range(ks):
            s0 = tap_start(dy, dx)
            win = actv[:, s0:s0 + THW]                           # (nh, THW) bf16
            if dx != pw:
                win = win * cmask_out[dx:dx + 1, :]
            acc = acc + jnp.dot(wgb_ref[dy * ks + dx], win,
                                preferred_element_type=jnp.float32)
    gb = acc + bgb_ref[...]                                      # (2Cn, THW) f32
    gamma = gb[:Cn, :]    # NOTE: with production Cn % 8 == 0 this split lands
    beta = gb[Cn:, :]     # on a sublane-tile boundary and is free.

    # ---- SPADE modulation; lane-dense (multiple-of-128) store.
    out_ref[0] = normalized * (1.0 + gamma) + beta


def _nearest_upsample_nchw(seg, H, W):
    # Matches F.interpolate(mode='nearest'): idx = floor(out_i * in / out)
    Hs, Ws = seg.shape[2], seg.shape[3]
    ih = (jnp.arange(H) * Hs) // H
    iw = (jnp.arange(W) * Ws) // W
    return seg[:, :, ih][:, :, :, iw]


def _pick_tile_rows(H, W, max_lanes=4096):
    """Largest divisor of H whose tile lane width is a multiple of 128."""
    best = None
    for th in range(1, H + 1):
        if H % th:
            continue
        if (th * W) % 128:
            continue
        if th * W > max_lanes:
            continue
        best = th
    return best if best is not None else H


def spade_apply(x_nchw, segmap_nchw, params, *, ks=3, eps=1e-5, tile_rows=None):
    """SPADE forward. x: (N, norm_nc, H, W); segmap: (N, label_nc, Hs, Ws)."""
    assert ks % 2 == 1, "odd kernel size expected"
    w1, b1, wg, bg, wb, bb = params                      # conv weights in HWIO
    N, Cn, H, W = x_nchw.shape
    Cl = segmap_nchw.shape[1]
    nh = w1.shape[3]
    pw = ks // 2
    HW = H * W

    # ---- Spatial tiling parameters (rows-of-image tiles, lane-dense).
    if tile_rows is None:
        tile_rows = _pick_tile_rows(H, W)
    if (H % tile_rows) or ((tile_rows * W) % 128 and tile_rows != H):
        tile_rows = H                                    # fallback: one tile/image
    TH = tile_rows
    T = H // TH
    THW = TH * W
    halo = 2 * pw + 2            # 2*pw rows of receptive field + 1 row of
                                 # column slack per conv stage (keeps every
                                 # tap window an in-bounds lane slice)
    LW = (TH + 2 * halo) * W     # seg tile lanes
    NA = TH + 2 * pw + 2         # actv rows computed per tile
    LA = NA * W

    x = x_nchw.reshape(N, Cn, HW).astype(jnp.float32)

    # ---- Hoisted instance-norm statistics (biased variance, eps in rsqrt).
    mean = jnp.mean(x, axis=2, keepdims=True)                       # (N, Cn, 1)
    var = jnp.mean(jnp.square(x - mean), axis=2, keepdims=True)
    rstd = lax.rsqrt(var + eps)

    # ---- Nearest upsample (wrapper-side XLA gather) + halo'd row tiles.
    seg_up = _nearest_upsample_nchw(segmap_nchw, H, W).astype(jnp.bfloat16)
    seg_pad = jnp.pad(seg_up, ((0, 0), (0, 0), (halo, halo), (0, 0)))
    row_idx = (jnp.arange(T)[:, None] * TH
               + jnp.arange(TH + 2 * halo)[None, :])                # (T, TH+2*halo)
    seg_tiles = seg_pad[:, :, row_idx, :]                           # (N, Cl, T, rows, W)
    seg_tiles = jnp.transpose(seg_tiles, (0, 2, 1, 3, 4)).reshape(N, T, Cl, LW)

    # ---- Conv weights: conv1 as (nh, ks*ks*Cl) matrix (K order dy, dx, cin);
    # gamma/beta stacked per tap as (ks*ks, 2Cn, nh) for per-tap accumulation.
    w1_mat = jnp.transpose(w1, (3, 0, 1, 2)).reshape(nh, ks * ks * Cl)
    w1_mat = w1_mat.astype(jnp.bfloat16)
    b1_col = b1.reshape(nh, 1).astype(jnp.float32)
    wgb = jnp.concatenate([wg, wb], axis=3)                         # (ks, ks, nh, 2Cn)
    wgb_taps = jnp.transpose(wgb, (0, 1, 3, 2)).reshape(ks * ks, 2 * Cn, nh)
    wgb_taps = wgb_taps.astype(jnp.bfloat16)
    bgb_col = jnp.concatenate([bg, bb]).reshape(2 * Cn, 1).astype(jnp.float32)

    # ---- Resident masks (hoisted out of the kernel).
    col = jnp.arange(LA) % W
    colmask = jnp.stack(
        [((col + (dx - pw) >= 0) & (col + (dx - pw) < W)) for dx in range(ks)],
        axis=0).astype(jnp.bfloat16)                                # (ks, LA)
    a_rows = jnp.arange(NA)[None, :]                                # actv-local rows
    g_rows = jnp.arange(T)[:, None] * TH + a_rows - (pw + 1)        # global rows
    rowmask = ((g_rows >= 0) & (g_rows < H)).astype(jnp.float32)    # (T, NA)
    rowmask = jnp.repeat(rowmask, W, axis=1).reshape(T, 1, LA)

    # ---- VMEM budget for the tiled working set (double-buffered I/O).
    io_bytes = 2 * (2 * Cn * THW * 4 + Cl * LW * 2 + LA * 4 + 2 * Cn * 4)
    resident = (nh * ks * ks * Cl * 2 + nh * 4
                + ks * ks * 2 * Cn * nh * 2 + 2 * Cn * 4 + ks * LA * 2)
    work = (ks * ks * Cl * LA * 2          # conv1 patch (bf16)
            + nh * LA * (4 + 2)            # actv f32 + bf16
            + 2 * Cn * THW * 4             # gamma/beta accumulator
            + 2 * Cn * THW * 4)            # normalized + temporaries
    est = io_bytes + resident + work
    vmem_limit = int(min(48 * 1024 * 1024, max(16 * 1024 * 1024, 4 * est)))

    kernel = functools.partial(spade_kernel, ks=ks, W=W)
    out = pl.pallas_call(
        kernel,
        out_shape=jax.ShapeDtypeStruct((N, Cn, HW), jnp.float32),
        grid_spec=pltpu.PrefetchScalarGridSpec(
            num_scalar_prefetch=0,
            grid=(N, T),
            in_specs=[
                pl.BlockSpec((1, Cn, THW), lambda n, t: (n, 0, t)),
                pl.BlockSpec((1, Cn, 1), lambda n, t: (n, 0, 0)),
                pl.BlockSpec((1, Cn, 1), lambda n, t: (n, 0, 0)),
                pl.BlockSpec((1, 1, Cl, LW), lambda n, t: (n, t, 0, 0)),
                pl.BlockSpec((nh, ks * ks * Cl), lambda n, t: (0, 0)),
                pl.BlockSpec((nh, 1), lambda n, t: (0, 0)),
                pl.BlockSpec((ks * ks, 2 * Cn, nh), lambda n, t: (0, 0, 0)),
                pl.BlockSpec((2 * Cn, 1), lambda n, t: (0, 0)),
                pl.BlockSpec((ks, LA), lambda n, t: (0, 0)),
                pl.BlockSpec((1, 1, LA), lambda n, t: (t, 0, 0)),
            ],
            out_specs=pl.BlockSpec((1, Cn, THW), lambda n, t: (n, 0, t)),
        ),
        compiler_params=pltpu.CompilerParams(
            dimension_semantics=("parallel", "parallel"),
            vmem_limit_bytes=vmem_limit),
    )(x, mean, rstd, seg_tiles, w1_mat, b1_col, wgb_taps, bgb_col,
      colmask, rowmask)

    return out.reshape(N, Cn, H, W)


# -------------------- pure-JAX reference for verification --------------------
def spade_ref(x_nchw, segmap_nchw, params, *, ks=3, eps=1e-5):
    w1, b1, wg, bg, wb, bb = params
    x = x_nchw.astype(jnp.float32)
    N, Cn, H, W = x.shape

    mean = jnp.mean(x, axis=(2, 3), keepdims=True)
    var = jnp.mean((x - mean) ** 2, axis=(2, 3), keepdims=True)
    normalized = (x - mean) * lax.rsqrt(var + eps)

    seg = _nearest_upsample_nchw(segmap_nchw.astype(jnp.float32), H, W)

    def conv(inp, w, b):  # inp NCHW, w HWIO
        y = lax.conv_general_dilated(inp, w, (1, 1), 'SAME',
                                     dimension_numbers=('NCHW', 'HWIO', 'NCHW'))
        return y + b.reshape(1, -1, 1, 1)

    actv = jnp.maximum(conv(seg, w1, b1), 0.0)
    gamma = conv(actv, wg, bg)
    beta = conv(actv, wb, bb)
    return normalized * (1 + gamma) + beta


if __name__ == "__main__":
    # SPADE('spadeinstance3x3', norm_nc=4, label_nc=3)
    norm_nc, label_nc, ks = 4, 3, 3
    nhidden = min(128, 2 * norm_nc)  # = 8
    N, H, W = 2, 16, 16
    Hs, Ws = 8, 8  # segmap gets nearest-upsampled to (H, W)

    key = jax.random.PRNGKey(0)
    kx, ks1, kw1, kb1, kwg, kbg, kwb, kbb = jax.random.split(key, 8)

    x = jax.random.normal(kx, (N, norm_nc, H, W), jnp.float32)
    segmap = jax.random.normal(ks1, (N, label_nc, Hs, Ws), jnp.float32)

    # Deterministic synthetic conv weights in HWIO layout (kh, kw, in, out).
    w1 = 0.1 * jax.random.normal(kw1, (ks, ks, label_nc, nhidden), jnp.float32)
    b1 = 0.1 * jax.random.normal(kb1, (nhidden,), jnp.float32)
    wg = 0.1 * jax.random.normal(kwg, (ks, ks, nhidden, norm_nc), jnp.float32)
    bg = 0.1 * jax.random.normal(kbg, (norm_nc,), jnp.float32)
    wb = 0.1 * jax.random.normal(kwb, (ks, ks, nhidden, norm_nc), jnp.float32)
    bb = 0.1 * jax.random.normal(kbb, (norm_nc,), jnp.float32)
    params = (w1, b1, wg, bg, wb, bb)

    # tile_rows=8 -> grid (N=2, T=2): 128-lane tiles, both image-border tiles
    # (top and bottom halo handling) are exercised.
    out = spade_apply(x, segmap, params, ks=ks, tile_rows=8)
    out = jax.block_until_ready(out)

    ref = jax.block_until_ready(spade_ref(x, segmap, params, ks=ks))
    assert out.shape == (N, norm_nc, H, W)
    # bf16 matmul operands / masking (f32 accumulation) -> loosened tolerance.
    assert jnp.allclose(out, ref, rtol=2e-2, atol=2e-2), (
        f"max abs err {jnp.max(jnp.abs(out - ref))}")

    print("KERNEL_OK")
</pallas_src>

<mosaic_0001>
module attributes {stable_mosaic.version = 11 : i64} {
  func.func @spade_kernel(%arg0: i32, %arg1: i32, %arg2: memref<1x4x128xf32, #tpu.memory_space<vmem>>, %arg3: memref<1x4x1xf32, #tpu.memory_space<vmem>>, %arg4: memref<1x4x1xf32, #tpu.memory_space<vmem>>, %arg5: memref<1x1x3x256xbf16, #tpu.memory_space<vmem>>, %arg6: memref<8x27xbf16, #tpu.memory_space<vmem>>, %arg7: memref<8x1xf32, #tpu.memory_space<vmem>>, %arg8: memref<9x8x8xbf16, #tpu.memory_space<vmem>>, %arg9: memref<8x1xf32, #tpu.memory_space<vmem>>, %arg10: memref<3x192xbf16, #tpu.memory_space<vmem>>, %arg11: memref<1x1x192xf32, #tpu.memory_space<vmem>>, %arg12: memref<1x4x128xf32, #tpu.memory_space<vmem>>) attributes {dimension_semantics = [#tpu.dimension_semantics<parallel>, #tpu.dimension_semantics<parallel>], iteration_bounds = array<i64: 2, 2>, scalar_prefetch = 0 : i64, scratch_operands = 0 : i64, tpu.core_type = #tpu.core_type<tc>, window_params = [{transform_indices = @transform_0, window_bounds = array<i64: 1, 4, 128>}, {transform_indices = @transform_1, window_bounds = array<i64: 1, 4, 1>}, {transform_indices = @transform_2, window_bounds = array<i64: 1, 4, 1>}, {transform_indices = @transform_3, window_bounds = array<i64: 1, 1, 3, 256>}, {pipeline_mode = #tpu.pipeline_mode<synchronous>, transform_indices = @transform_4, window_bounds = array<i64: 8, 27>}, {pipeline_mode = #tpu.pipeline_mode<synchronous>, transform_indices = @transform_5, window_bounds = array<i64: 8, 1>}, {pipeline_mode = #tpu.pipeline_mode<synchronous>, transform_indices = @transform_6, window_bounds = array<i64: 9, 8, 8>}, {pipeline_mode = #tpu.pipeline_mode<synchronous>, transform_indices = @transform_7, window_bounds = array<i64: 8, 1>}, {pipeline_mode = #tpu.pipeline_mode<synchronous>, transform_indices = @transform_8, window_bounds = array<i64: 3, 192>}, {transform_indices = @transform_9, window_bounds = array<i64: 1, 1, 192>}, {transform_indices = @transform_10, window_bounds = array<i64: 1, 4, 128>}]} {
    %c0 = arith.constant 0 : index
    %c0_0 = arith.constant 0 : index
    %c0_1 = arith.constant 0 : index
    %0 = vector.load %arg2[%c0, %c0_0, %c0_1] : memref<1x4x128xf32, #tpu.memory_space<vmem>>, vector<1x4x128xf32>
    %1 = vector.shape_cast %0 : vector<1x4x128xf32> to vector<4x128xf32>
    %c0_2 = arith.constant 0 : index
    %c0_3 = arith.constant 0 : index
    %c0_4 = arith.constant 0 : index
    %2 = vector.load %arg3[%c0_2, %c0_3, %c0_4] : memref<1x4x1xf32, #tpu.memory_space<vmem>>, vector<1x4x1xf32>
    %3 = vector.shape_cast %2 : vector<1x4x1xf32> to vector<4x1xf32>
    %4 = vector.broadcast %3 : vector<4x1xf32> to vector<4x128xf32>
    %5 = arith.subf %1, %4 : vector<4x128xf32>
    %c0_5 = arith.constant 0 : index
    %c0_6 = arith.constant 0 : index
    %c0_7 = arith.constant 0 : index
    %6 = vector.load %arg4[%c0_5, %c0_6, %c0_7] : memref<1x4x1xf32, #tpu.memory_space<vmem>>, vector<1x4x1xf32>
    %7 = vector.shape_cast %6 : vector<1x4x1xf32> to vector<4x1xf32>
    %8 = vector.broadcast %7 : vector<4x1xf32> to vector<4x128xf32>
    %9 = arith.mulf %5, %8 : vector<4x128xf32>
    %c0_8 = arith.constant 0 : index
    %c0_9 = arith.constant 0 : index
    %c0_10 = arith.constant 0 : index
    %c0_11 = arith.constant 0 : index
    %10 = vector.load %arg5[%c0_8, %c0_9, %c0_10, %c0_11] : memref<1x1x3x256xbf16, #tpu.memory_space<vmem>>, vector<1x1x3x256xbf16>
    %11 = vector.shape_cast %10 : vector<1x1x3x256xbf16> to vector<3x256xbf16>
    %c0_12 = arith.constant 0 : index
    %c0_13 = arith.constant 0 : index
    %12 = vector.load %arg10[%c0_12, %c0_13] : memref<3x192xbf16, #tpu.memory_space<vmem>>, vector<3x192xbf16>
    %13 = vector.extract_strided_slice %11 {offsets = [0, 15], sizes = [3, 192], strides = [1, 1]} : vector<3x256xbf16> to vector<3x192xbf16>
    %14 = vector.extract_strided_slice %12 {offsets = [0, 0], sizes = [1, 192], strides = [1, 1]} : vector<3x192xbf16> to vector<1x192xbf16>
    %15 = vector.broadcast %14 : vector<1x192xbf16> to vector<3x192xbf16>
    %16 = arith.mulf %13, %15 : vector<3x192xbf16>
    %17 = vector.extract_strided_slice %11 {offsets = [0, 16], sizes = [3, 192], strides = [1, 1]} : vector<3x256xbf16> to vector<3x192xbf16>
    %18 = vector.extract_strided_slice %11 {offsets = [0, 17], sizes = [3, 192], strides = [1, 1]} : vector<3x256xbf16> to vector<3x192xbf16>
    %19 = vector.extract_strided_slice %12 {offsets = [2, 0], sizes = [1, 192], strides = [1, 1]} : vector<3x192xbf16> to vector<1x192xbf16>
    %20 = vector.broadcast %19 : vector<1x192xbf16> to vector<3x192xbf16>
    %21 = arith.mulf %18, %20 : vector<3x192xbf16>
    %22 = vector.extract_strided_slice %11 {offsets = [0, 31], sizes = [3, 192], strides = [1, 1]} : vector<3x256xbf16> to vector<3x192xbf16>
    %23 = vector.extract_strided_slice %12 {offsets = [0, 0], sizes = [1, 192], strides = [1, 1]} : vector<3x192xbf16> to vector<1x192xbf16>
    %24 = vector.broadcast %23 : vector<1x192xbf16> to vector<3x192xbf16>
    %25 = arith.mulf %22, %24 : vector<3x192xbf16>
    %26 = vector.extract_strided_slice %11 {offsets = [0, 32], sizes = [3, 192], strides = [1, 1]} : vector<3x256xbf16> to vector<3x192xbf16>
    %27 = vector.extract_strided_slice %11 {offsets = [0, 33], sizes = [3, 192], strides = [1, 1]} : vector<3x256xbf16> to vector<3x192xbf16>
    %28 = vector.extract_strided_slice %12 {offsets = [2, 0], sizes = [1, 192], strides = [1, 1]} : vector<3x192xbf16> to vector<1x192xbf16>
    %29 = vector.broadcast %28 : vector<1x192xbf16> to vector<3x192xbf16>
    %30 = arith.mulf %27, %29 : vector<3x192xbf16>
    %31 = vector.extract_strided_slice %11 {offsets = [0, 47], sizes = [3, 192], strides = [1, 1]} : vector<3x256xbf16> to vector<3x192xbf16>
    %32 = vector.extract_strided_slice %12 {offsets = [0, 0], sizes = [1, 192], strides = [1, 1]} : vector<3x192xbf16> to vector<1x192xbf16>
    %33 = vector.broadcast %32 : vector<1x192xbf16> to vector<3x192xbf16>
    %34 = arith.mulf %31, %33 : vector<3x192xbf16>
    %35 = vector.extract_strided_slice %11 {offsets = [0, 48], sizes = [3, 192], strides = [1, 1]} : vector<3x256xbf16> to vector<3x192xbf16>
    %36 = vector.extract_strided_slice %11 {offsets = [0, 49], sizes = [3, 192], strides = [1, 1]} : vector<3x256xbf16> to vector<3x192xbf16>
    %37 = vector.extract_strided_slice %12 {offsets = [2, 0], sizes = [1, 192], strides = [1, 1]} : vector<3x192xbf16> to vector<1x192xbf16>
    %38 = vector.broadcast %37 : vector<1x192xbf16> to vector<3x192xbf16>
    %39 = arith.mulf %36, %38 : vector<3x192xbf16>
    %40 = tpu.concatenate %16, %17, %21, %25, %26, %30, %34, %35, %39 in 0 : vector<3x192xbf16>, vector<3x192xbf16>, vector<3x192xbf16>, vector<3x192xbf16>, vector<3x192xbf16>, vector<3x192xbf16>, vector<3x192xbf16>, vector<3x192xbf16>, vector<3x192xbf16> -> vector<27x192xbf16>
    %c0_14 = arith.constant 0 : index
    %c0_15 = arith.constant 0 : index
    %41 = vector.load %arg6[%c0_14, %c0_15] : memref<8x27xbf16, #tpu.memory_space<vmem>>, vector<8x27xbf16>
    %cst = arith.constant dense<0.000000e+00> : vector<8x192xf32>
    %42 = tpu.matmul %41, %40, %cst {dimension_numbers = #tpu.dot_dimension_numbers<[1], [0], [0], [1], [0, 0, 1, 1], [], []>} : vector<8x27xbf16>, vector<27x192xbf16>, vector<8x192xf32> -> vector<8x192xf32>
    %c0_16 = arith.constant 0 : index
    %c0_17 = arith.constant 0 : index
    %43 = vector.load %arg7[%c0_16, %c0_17] : memref<8x1xf32, #tpu.memory_space<vmem>>, vector<8x1xf32>
    %44 = vector.broadcast %43 : vector<8x1xf32> to vector<8x192xf32>
    %45 = arith.addf %42, %44 : vector<8x192xf32>
    %cst_18 = arith.constant 0.000000e+00 : f32
    %46 = vector.broadcast %cst_18 : f32 to vector<8x192xf32>
    %47 = arith.maximumf %45, %46 : vector<8x192xf32>
    %c0_19 = arith.constant 0 : index
    %c0_20 = arith.constant 0 : index
    %c0_21 = arith.constant 0 : index
    %48 = vector.load %arg11[%c0_19, %c0_20, %c0_21] : memref<1x1x192xf32, #tpu.memory_space<vmem>>, vector<1x1x192xf32>
    %49 = vector.shape_cast %48 : vector<1x1x192xf32> to vector<1x192xf32>
    %50 = vector.broadcast %49 : vector<1x192xf32> to vector<8x192xf32>
    %51 = arith.mulf %47, %50 : vector<8x192xf32>
    %52 = arith.truncf %51 : vector<8x192xf32> to vector<8x192xbf16>
    %cst_22 = arith.constant 0.000000e+00 : f32
    %53 = vector.broadcast %cst_22 : f32 to vector<8x128xf32>
    %54 = vector.extract_strided_slice %12 {offsets = [0, 0], sizes = [3, 128], strides = [1, 1]} : vector<3x192xbf16> to vector<3x128xbf16>
    %55 = vector.extract_strided_slice %52 {offsets = [0, 15], sizes = [8, 128], strides = [1, 1]} : vector<8x192xbf16> to vector<8x128xbf16>
    %56 = vector.extract_strided_slice %54 {offsets = [0, 0], sizes = [1, 128], strides = [1, 1]} : vector<3x128xbf16> to vector<1x128xbf16>
    %57 = vector.broadcast %56 : vector<1x128xbf16> to vector<8x128xbf16>
    %58 = arith.mulf %55, %57 : vector<8x128xbf16>
    %c0_23 = arith.constant 0 : index
    %c0_24 = arith.constant 0 : index
    %c0_25 = arith.constant 0 : index
    %59 = vector.load %arg8[%c0_23, %c0_24, %c0_25] : memref<9x8x8xbf16, #tpu.memory_space<vmem>>, vector<1x8x8xbf16>
    %60 = vector.shape_cast %59 : vector<1x8x8xbf16> to vector<8x8xbf16>
    %cst_26 = arith.constant dense<0.000000e+00> : vector<8x128xf32>
    %61 = tpu.matmul %60, %58, %cst_26 {dimension_numbers = #tpu.dot_dimension_numbers<[1], [0], [0], [1], [0, 0, 1, 1], [], []>} : vector<8x8xbf16>, vector<8x128xbf16>, vector<8x128xf32> -> vector<8x128xf32>
    %62 = arith.addf %53, %61 : vector<8x128xf32>
    %63 = vector.extract_strided_slice %52 {offsets = [0, 16], sizes = [8, 128], strides = [1, 1]} : vector<8x192xbf16> to vector<8x128xbf16>
    %c1 = arith.constant 1 : index
    %c0_27 = arith.constant 0 : index
    %c0_28 = arith.constant 0 : index
    %64 = vector.load %arg8[%c1, %c0_27, %c0_28] : memref<9x8x8xbf16, #tpu.memory_space<vmem>>, vector<1x8x8xbf16>
    %65 = vector.shape_cast %64 : vector<1x8x8xbf16> to vector<8x8xbf16>
    %cst_29 = arith.constant dense<0.000000e+00> : vector<8x128xf32>
    %66 = tpu.matmul %65, %63, %cst_29 {dimension_numbers = #tpu.dot_dimension_numbers<[1], [0], [0], [1], [0, 0, 1, 1], [], []>} : vector<8x8xbf16>, vector<8x128xbf16>, vector<8x128xf32> -> vector<8x128xf32>
    %67 = arith.addf %62, %66 : vector<8x128xf32>
    %68 = vector.extract_strided_slice %52 {offsets = [0, 17], sizes = [8, 128], strides = [1, 1]} : vector<8x192xbf16> to vector<8x128xbf16>
    %69 = vector.extract_strided_slice %54 {offsets = [2, 0], sizes = [1, 128], strides = [1, 1]} : vector<3x128xbf16> to vector<1x128xbf16>
    %70 = vector.broadcast %69 : vector<1x128xbf16> to vector<8x128xbf16>
    %71 = arith.mulf %68, %70 : vector<8x128xbf16>
    %c2 = arith.constant 2 : index
    %c0_30 = arith.constant 0 : index
    %c0_31 = arith.constant 0 : index
    %72 = vector.load %arg8[%c2, %c0_30, %c0_31] : memref<9x8x8xbf16, #tpu.memory_space<vmem>>, vector<1x8x8xbf16>
    %73 = vector.shape_cast %72 : vector<1x8x8xbf16> to vector<8x8xbf16>
    %cst_32 = arith.constant dense<0.000000e+00> : vector<8x128xf32>
    %74 = tpu.matmul %73, %71, %cst_32 {dimension_numbers = #tpu.dot_dimension_numbers<[1], [0], [0], [1], [0, 0, 1, 1], [], []>} : vector<8x8xbf16>, vector<8x128xbf16>, vector<8x128xf32> -> vector<8x128xf32>
    %75 = arith.addf %67, %74 : vector<8x128xf32>
    %76 = vector.extract_strided_slice %52 {offsets = [0, 31], sizes = [8, 128], strides = [1, 1]} : vector<8x192xbf16> to vector<8x128xbf16>
    %77 = vector.extract_strided_slice %54 {offsets = [0, 0], sizes = [1, 128], strides = [1, 1]} : vector<3x128xbf16> to vector<1x128xbf16>
    %78 = vector.broadcast %77 : vector<1x128xbf16> to vector<8x128xbf16>
    %79 = arith.mulf %76, %78 : vector<8x128xbf16>
    %c3 = arith.constant 3 : index
    %c0_33 = arith.constant 0 : index
    %c0_34 = arith.constant 0 : index
    %80 = vector.load %arg8[%c3, %c0_33, %c0_34] : memref<9x8x8xbf16, #tpu.memory_space<vmem>>, vector<1x8x8xbf16>
    %81 = vector.shape_cast %80 : vector<1x8x8xbf16> to vector<8x8xbf16>
    %cst_35 = arith.constant dense<0.000000e+00> : vector<8x128xf32>
    %82 = tpu.matmul %81, %79, %cst_35 {dimension_numbers = #tpu.dot_dimension_numbers<[1], [0], [0], [1], [0, 0, 1, 1], [], []>} : vector<8x8xbf16>, vector<8x128xbf16>, vector<8x128xf32> -> vector<8x128xf32>
    %83 = arith.addf %75, %82 : vector<8x128xf32>
    %84 = vector.extract_strided_slice %52 {offsets = [0, 32], sizes = [8, 128], strides = [1, 1]} : vector<8x192xbf16> to vector<8x128xbf16>
    %c4 = arith.constant 4 : index
    %c0_36 = arith.constant 0 : index
    %c0_37 = arith.constant 0 : index
    %85 = vector.load %arg8[%c4, %c0_36, %c0_37] : memref<9x8x8xbf16, #tpu.memory_space<vmem>>, vector<1x8x8xbf16>
    %86 = vector.shape_cast %85 : vector<1x8x8xbf16> to vector<8x8xbf16>
    %cst_38 = arith.constant dense<0.000000e+00> : vector<8x128xf32>
    %87 = tpu.matmul %86, %84, %cst_38 {dimension_numbers = #tpu.dot_dimension_numbers<[1], [0], [0], [1], [0, 0, 1, 1], [], []>} : vector<8x8xbf16>, vector<8x128xbf16>, vector<8x128xf32> -> vector<8x128xf32>
    %88 = arith.addf %83, %87 : vector<8x128xf32>
    %89 = vector.extract_strided_slice %52 {offsets = [0, 33], sizes = [8, 128], strides = [1, 1]} : vector<8x192xbf16> to vector<8x128xbf16>
    %90 = vector.extract_strided_slice %54 {offsets = [2, 0], sizes = [1, 128], strides = [1, 1]} : vector<3x128xbf16> to vector<1x128xbf16>
    %91 = vector.broadcast %90 : vector<1x128xbf16> to vector<8x128xbf16>
    %92 = arith.mulf %89, %91 : vector<8x128xbf16>
    %c5 = arith.constant 5 : index
    %c0_39 = arith.constant 0 : index
    %c0_40 = arith.constant 0 : index
    %93 = vector.load %arg8[%c5, %c0_39, %c0_40] : memref<9x8x8xbf16, #tpu.memory_space<vmem>>, vector<1x8x8xbf16>
    %94 = vector.shape_cast %93 : vector<1x8x8xbf16> to vector<8x8xbf16>
    %cst_41 = arith.constant dense<0.000000e+00> : vector<8x128xf32>
    %95 = tpu.matmul %94, %92, %cst_41 {dimension_numbers = #tpu.dot_dimension_numbers<[1], [0], [0], [1], [0, 0, 1, 1], [], []>} : vector<8x8xbf16>, vector<8x128xbf16>, vector<8x128xf32> -> vector<8x128xf32>
    %96 = arith.addf %88, %95 : vector<8x128xf32>
    %97 = vector.extract_strided_slice %52 {offsets = [0, 47], sizes = [8, 128], strides = [1, 1]} : vector<8x192xbf16> to vector<8x128xbf16>
    %98 = vector.extract_strided_slice %54 {offsets = [0, 0], sizes = [1, 128], strides = [1, 1]} : vector<3x128xbf16> to vector<1x128xbf16>
    %99 = vector.broadcast %98 : vector<1x128xbf16> to vector<8x128xbf16>
    %100 = arith.mulf %97, %99 : vector<8x128xbf16>
    %c6 = arith.constant 6 : index
    %c0_42 = arith.constant 0 : index
    %c0_43 = arith.constant 0 : index
    %101 = vector.load %arg8[%c6, %c0_42, %c0_43] : memref<9x8x8xbf16, #tpu.memory_space<vmem>>, vector<1x8x8xbf16>
    %102 = vector.shape_cast %101 : vector<1x8x8xbf16> to vector<8x8xbf16>
    %cst_44 = arith.constant dense<0.000000e+00> : vector<8x128xf32>
    %103 = tpu.matmul %102, %100, %cst_44 {dimension_numbers = #tpu.dot_dimension_numbers<[1], [0], [0], [1], [0, 0, 1, 1], [], []>} : vector<8x8xbf16>, vector<8x128xbf16>, vector<8x128xf32> -> vector<8x128xf32>
    %104 = arith.addf %96, %103 : vector<8x128xf32>
    %105 = vector.extract_strided_slice %52 {offsets = [0, 48], sizes = [8, 128], strides = [1, 1]} : vector<8x192xbf16> to vector<8x128xbf16>
    %c7 = arith.constant 7 : index
    %c0_45 = arith.constant 0 : index
    %c0_46 = arith.constant 0 : index
    %106 = vector.load %arg8[%c7, %c0_45, %c0_46] : memref<9x8x8xbf16, #tpu.memory_space<vmem>>, vector<1x8x8xbf16>
    %107 = vector.shape_cast %106 : vector<1x8x8xbf16> to vector<8x8xbf16>
    %cst_47 = arith.constant dense<0.000000e+00> : vector<8x128xf32>
    %108 = tpu.matmul %107, %105, %cst_47 {dimension_numbers = #tpu.dot_dimension_numbers<[1], [0], [0], [1], [0, 0, 1, 1], [], []>} : vector<8x8xbf16>, vector<8x128xbf16>, vector<8x128xf32> -> vector<8x128xf32>
    %109 = arith.addf %104, %108 : vector<8x128xf32>
    %110 = vector.extract_strided_slice %52 {offsets = [0, 49], sizes = [8, 128], strides = [1, 1]} : vector<8x192xbf16> to vector<8x128xbf16>
    %111 = vector.extract_strided_slice %54 {offsets = [2, 0], sizes = [1, 128], strides = [1, 1]} : vector<3x128xbf16> to vector<1x128xbf16>
    %112 = vector.broadcast %111 : vector<1x128xbf16> to vector<8x128xbf16>
    %113 = arith.mulf %110, %112 : vector<8x128xbf16>
    %c8 = arith.constant 8 : index
    %c0_48 = arith.constant 0 : index
    %c0_49 = arith.constant 0 : index
    %114 = vector.load %arg8[%c8, %c0_48, %c0_49] : memref<9x8x8xbf16, #tpu.memory_space<vmem>>, vector<1x8x8xbf16>
    %115 = vector.shape_cast %114 : vector<1x8x8xbf16> to vector<8x8xbf16>
    %cst_50 = arith.constant dense<0.000000e+00> : vector<8x128xf32>
    %116 = tpu.matmul %115, %113, %cst_50 {dimension_numbers = #tpu.dot_dimension_numbers<[1], [0], [0], [1], [0, 0, 1, 1], [], []>} : vector<8x8xbf16>, vector<8x128xbf16>, vector<8x128xf32> -> vector<8x128xf32>
    %117 = arith.addf %109, %116 : vector<8x128xf32>
    %c0_51 = arith.constant 0 : index
    %c0_52 = arith.constant 0 : index
    %118 = vector.load %arg9[%c0_51, %c0_52] : memref<8x1xf32, #tpu.memory_space<vmem>>, vector<8x1xf32>
    %119 = vector.broadcast %118 : vector<8x1xf32> to vector<8x128xf32>
    %120 = arith.addf %117, %119 : vector<8x128xf32>
    %121 = vector.extract_strided_slice %120 {offsets = [0, 0], sizes = [4, 128], strides = [1, 1]} : vector<8x128xf32> to vector<4x128xf32>
    %122 = vector.extract_strided_slice %120 {offsets = [4, 0], sizes = [4, 128], strides = [1, 1]} : vector<8x128xf32> to vector<4x128xf32>
    %cst_53 = arith.constant 1.000000e+00 : f32
    %123 = vector.broadcast %cst_53 : f32 to vector<4x128xf32>
    %124 = arith.addf %123, %121 : vector<4x128xf32>
    %125 = arith.mulf %9, %124 : vector<4x128xf32>
    %126 = arith.addf %125, %122 : vector<4x128xf32>
    %c0_54 = arith.constant 0 : index
    %c0_55 = arith.constant 0 : index
    %c0_56 = arith.constant 0 : index
    %127 = vector.load %arg12[%c0_54, %c0_55, %c0_56] : memref<1x4x128xf32, #tpu.memory_space<vmem>>, vector<1x4x128xf32>
    %128 = vector.shape_cast %127 : vector<1x4x128xf32> to vector<4x128xf32>
    %129 = vector.shape_cast %126 : vector<4x128xf32> to vector<1x4x128xf32>
    tpu.vector_store %arg12[%c0_54, %c0_55, %c0_56], %129 {strides = array<i32>} : memref<1x4x128xf32, #tpu.memory_space<vmem>>, vector<1x4x128xf32>,
    return
  }
  func.func @transform_0(%arg0: i32, %arg1: i32) -> (i32, i32, i32) {
    %c0_i32 = arith.constant 0 : i32
    %c0_i32_0 = arith.constant 0 : i32
    return %arg0, %c0_i32, %arg1 : i32, i32, i32
  }
  func.func @transform_1(%arg0: i32, %arg1: i32) -> (i32, i32, i32) {
    %c0_i32 = arith.constant 0 : i32
    %c0_i32_0 = arith.constant 0 : i32
    %c0_i32_1 = arith.constant 0 : i32
    return %arg0, %c0_i32, %c0_i32_0 : i32, i32, i32
  }
  func.func @transform_2(%arg0: i32, %arg1: i32) -> (i32, i32, i32) {
    %c0_i32 = arith.constant 0 : i32
    %c0_i32_0 = arith.constant 0 : i32
    %c0_i32_1 = arith.constant 0 : i32
    return %arg0, %c0_i32, %c0_i32_0 : i32, i32, i32
  }
  func.func @transform_3(%arg0: i32, %arg1: i32) -> (i32, i32, i32, i32) {
    %c0_i32 = arith.constant 0 : i32
    %c0_i32_0 = arith.constant 0 : i32
    %c0_i32_1 = arith.constant 0 : i32
    return %arg0, %arg1, %c0_i32, %c0_i32_0 : i32, i32, i32, i32
  }
  func.func @transform_4(%arg0: i32, %arg1: i32) -> (i32, i32) {
    %c0_i32 = arith.constant 0 : i32
    %c0_i32_0 = arith.constant 0 : i32
    %c0_i32_1 = arith.constant 0 : i32
    return %c0_i32, %c0_i32_0 : i32, i32
  }
  func.func @transform_5(%arg0: i32, %arg1: i32) -> (i32, i32) {
    %c0_i32 = arith.constant 0 : i32
    %c0_i32_0 = arith.constant 0 : i32
    %c0_i32_1 = arith.constant 0 : i32
    return %c0_i32, %c0_i32_0 : i32, i32
  }
  func.func @transform_6(%arg0: i32, %arg1: i32) -> (i32, i32, i32) {
    %c0_i32 = arith.constant 0 : i32
    %c0_i32_0 = arith.constant 0 : i32
    %c0_i32_1 = arith.constant 0 : i32
    %c0_i32_2 = arith.constant 0 : i32
    return %c0_i32, %c0_i32_0, %c0_i32_1 : i32, i32, i32
  }
  func.func @transform_7(%arg0: i32, %arg1: i32) -> (i32, i32) {
    %c0_i32 = arith.constant 0 : i32
    %c0_i32_0 = arith.constant 0 : i32
    %c0_i32_1 = arith.constant 0 : i32
    return %c0_i32, %c0_i32_0 : i32, i32
  }
  func.func @transform_8(%arg0: i32, %arg1: i32) -> (i32, i32) {
    %c0_i32 = arith.constant 0 : i32
    %c0_i32_0 = arith.constant 0 : i32
    %c0_i32_1 = arith.constant 0 : i32
    return %c0_i32, %c0_i32_0 : i32, i32
  }
  func.func @transform_9(%arg0: i32, %arg1: i32) -> (i32, i32, i32) {
    %c0_i32 = arith.constant 0 : i32
    %c0_i32_0 = arith.constant 0 : i32
    %c0_i32_1 = arith.constant 0 : i32
    return %arg1, %c0_i32, %c0_i32_0 : i32, i32, i32
  }
  func.func @transform_10(%arg0: i32, %arg1: i32) -> (i32, i32, i32) {
    %c0_i32 = arith.constant 0 : i32
    %c0_i32_0 = arith.constant 0 : i32
    return %arg0, %c0_i32, %arg1 : i32, i32, i32
  }
}

</mosaic_0001>

<bundles_post_ra>
// kernel: tpu_custom_call.1
= control target key start
LH: loop header
LB: loop body
LE: loop exit
PB: predicated region body
PF: predicated region fallthrough
CT: control target
= control target key end

     0   :  { %s2410_s0 = inlined_call_operand.vmem [shape: f32[2,4,256], index: 0, kind: input, shape index: {}]   ;;  %s2411_s1 = inlined_call_operand.vmem [shape: f32[2,4,1], index: 1, kind: input, shape index: {}]   ;;  %s2412_s2 = inlined_call_operand.vmem [shape: f32[2,4,1], index: 2, kind: input, shape index: {}]   ;;  %s2413_s3 = inlined_call_operand.vmem [shape: bf16[2,2,3,256], index: 3, kind: input, shape index: {}]   ;;  %s2414_s4 = inlined_call_operand.vmem [shape: bf16[8,27], index: 4, kind: input, shape index: {}]   ;;  %s2415_s5 = inlined_call_operand.vmem [shape: f32[8,1], index: 5, kind: input, shape index: {}]   ;;  %s2416_s6 = inlined_call_operand.vmem [shape: bf16[9,8,8], index: 6, kind: input, shape index: {}]   ;;  %s2417_s7 = inlined_call_operand.vmem [shape: f32[8,1], index: 7, kind: input, shape index: {}]   ;;  %s2418_s8 = inlined_call_operand.vmem [shape: bf16[3,192], index: 8, kind: input, shape index: {}]   ;;  %s2419_s9 = inlined_call_operand.vmem [shape: f32[2,1,192], index: 9, kind: input, shape index: {}]   ;;  %s2420_s10 = inlined_call_operand.hbm [shape: f32[2,4,256], index: 10, kind: output, shape index: {}]  }
   0x1   :  { %2437 = sst [smem:[#allocation8_spill]] %s2413_s3 }
   0x2   :  { %2438 = sst [smem:[#allocation9_spill]] %s2414_s4 }
   0x3   :  { %2439 = sst [smem:[#allocation10_spill]] %s2418_s8 }
   0x4   :  { %15 = vsyncpa [#allocation3], 0 }
   0x5   :  { %17 = vsyncpa [#allocation3 + $0x1], 0  ;;  %s2018_s13 = smov 0   ;;  %s2020_s14 = smov 0  }
   0x6   :  { %s2022_s15 = smov 0   ;;  %s2024_s16 = smov 0  }
   0x7   :  { %s2026_s17 = smov 0   ;;  %s2028_s18 = smov 0  }
   0x8   :  { %s2030_s19 = smov 0   ;;  %s2032_s20 = smov 0  }
   0x9 LB: > { %2440 = sst [smem:[#allocation5_spill]] %s1932_s19  ;;  %s1630_s21 = sadd.s32 4294967295, %s1936_s20   ;;  %s1936_s20 = sphi %s2032_s20, %s23_s20   ;;  %s1932_s19 = sphi %s2030_s19, %s2469_s19   ;;  %s1928_s18 = sphi %s2028_s18, %s2474_s18   ;;  %s1924_s17 = sphi %s2026_s17, %s2467_s17   ;;  %s1920_s16 = sphi %s2024_s16, %s2473_s16   ;;  %s1916_s15 = sphi %s2022_s15, %s2472_s15   ;;  %s1912_s14 = sphi %s2020_s14, %s2471_s14   ;;  %s1908_s13 = sphi %s2018_s13, %s2470_s13  }
   0xa   : > { %s1631_s22 = sadd.s32 4294967294, %s1936_s20   ;;  %s32_s23 = sadd.s32 1, %s1928_s18 }
   0xb   : > { %p33_p0 = scmp.ge.s32.totalorder %s32_s23, 2  ;;  %s35_s24 = sadd.s32 1, %s1932_s19 }
   0xc   : > { %p293_p1 = scmp.ne.s32.totalorder %s1916_s15, %s1912_s14  ;;  %p294_p2 = scmp.eq.s32.totalorder %s1630_s21, 3 }
   0xd   : > { %s2476_s23 = smov (%p33_p0, %s32_s23), 0  ;;  %s2478_s24 = smov (!%p33_p0, %s35_s24), %s1932_s19 }
   0xe   : > { %2441 = sst [smem:[#allocation6_spill]] %s2476_s23  ;;  %s279_s25 = ssub.s32 %s1928_s18, %s2476_s23 }
   0xf   : > { %p2069_p3 = por %p294_p2, %p293_p1  ;;  %p37_p4 = scmp.ge.s32.totalorder %s2478_s24, 2 }
  0x10   : > { %p299_p5 = scmp.ne.s32.totalorder %s1912_s14, %s1908_s13  ;;  %p300_p6 = scmp.eq.s32.totalorder %s1631_s22, 3 }
  0x11   : > { %p1634_p7 = scmp.ge.s32.totalorder %s1936_s20, 1  ;;  %s2480_s24 = smov (%p37_p4, %s2478_s24), 0 }
  0x12   : > { %2443 = sst [smem:[#allocation7_spill]] %s2480_s24  ;;  %p2078_p8 = por %p300_p6, %p299_p5 }
  0x13   : > { %p377_p9 = scmp.lt.s32.totalorder %s1936_s20, 5  ;;  %s278_s28 = ssub.s32 %s1932_s19, %s2480_s24 }
  0x14   : > { %s283_s29 = sadd.s32 1, %s1916_s15  ;;  %s280_s30 = sor.u32 %s279_s25, %s278_s28 }
  0x15   : > { %p378_p10 = pnand %p1634_p7, %p377_p9  ;;  %p281_p11 = scmp.eq.s32.totalorder %s280_s30, 0 }
  0x16   : > { %v490_v0 = vlaneseq (!%p378_p10)  ;;  %v1938_v1 = vmov (!%p378_p10), 1983009808   ;;  %p439_p12 = scmp.lt.s32.totalorder (!%p378_p10), %s1924_s17, 1  ;;  %p441_p13 = scmp.lt.s32.totalorder (!%p378_p10), %s1920_s16, 1  ;;  %vm547_vm0 = vcmask (!%p378_p10), 138240   ;;  %vm554_vm1 = vcmask (!%p378_p10), 252928  }
  0x17   : > { %s2087_s11 = scalar_select %p281_p11, %s1916_s15, %s283_s29  }
  0x18   : > { %381 = sbr.rel (%p378_p10) target bundleno = 1038 (0x40e), region = 60  ;;  %v488_v2 = vunpack.c.l.s4 (!%p378_p10), %v1938_v1  ;;  %v491_v3 = vshrl.u32 (!%p378_p10), %v490_v0, 7  ;;  %s2445_s8 = sld [smem:[#allocation10_spill]] (!%p378_p10)  ;;  %vm568_vm2 = vcmask (!%p378_p10), 384000   ;;  %vm561_vm3 = vcmask (!%p378_p10), 269312  }
  0x19   : > { %s2446_s3 = sld [smem:[#allocation8_spill]] (!%p378_p10)  ;;  %s2425_s21 = smov (!%p378_p10), 49   ;;  %vm575_vm4 = vcmask (!%p378_p10), 400384   ;;  %vm522_vm5 = vcmask (!%p378_p10), 121856   ;;  %vm686_vm6 = vcmask (!%p378_p10), 908288   ;;  %vm619_vm7 = vcmask (!%p378_p10), 1039360  }
  0x1a   : > { %v489_v4 = vunpack.c.0.s8 (!%p378_p10), %v488_v2  ;;  %v2109_v8 = vsub.s32 (!%p378_p10), 1, %v491_v3  ;;  %v2111_v9 = vsub.s32 (!%p378_p10), 0, %v491_v3  ;;  %vm770_vm8 = vcmask (!%p378_p10), 1041408   ;;  %s2458_s23 = smov (!%p378_p10), 33   ;;  %s2459_s19 = smov (!%p378_p10), 49  }
  0x1b   : > { %vm771_vm9 = vsmask.f32 (!%p378_p10), 1280  ;;  %vm638_vm10 = vcmask (!%p378_p10), 1031168   ;;  %vm784_vm11 = vcmask (!%p378_p10), 1044480   ;;  %vm785_vm12 = vsmask.f32 (!%p378_p10), 4352 }
  0x1c   : > { %v2099_v6 = vsub.s32 (!%p378_p10), %v489_v4, %v491_v3  ;;  %vm739_vm14 = vcmask (!%p378_p10), 785408   ;;  %vm775_vm15 = vcmask (!%p378_p10), 1042432   ;;  %vm789_vm13 = vcmask (!%p378_p10), 1045504   ;;  %s2460_s4 = sld [smem:[#allocation9_spill]] (!%p378_p10) }
  0x1e   : > { %v2094_v5 = vld [vmem:[%s2445_s8] sm:$0xf] (!%p378_p10)  ;;  %s2423_s8 = smov (!%p378_p10), 17  }
  0x1f   : > { %s2097_s22 = scalar_select %p439_p12, %s1924_s17, 1  ;;  %v493_v7 = vrot.slane %v2094_v5, %v2099_v6 }
  0x20   : > { %s2102_s25 = scalar_select %p441_p13, %s1920_s16, 1 }
  0x21   : > { %s2105_s28 = sshll.u32 %s2097_s22, 2  ;;  %v494_v10 = vcombine.high %v493_v7, %v493_v7  ;;  %v496_v11 = vpack.i.b16 %v493_v7, %v493_v7 }
  0x22   : > { %s2422_s29 = sshll.u32 %s2102_s25, 1 }
  0x23   : > { %s461_s30 = sadd.s32 %s2422_s29, %s2105_s28  ;;  %v503_v12 = vpack.i.b16 %v494_v10, %v494_v10  ;;  %v529_v13 = vrot.slane %v496_v11, %v2109_v8  ;;  %v501_v14 = vrot.slane %v496_v11, %v2111_v9  ;;  %s2428_s29 = smov 111  }
  0x24   : > { %s1642_s12 = sshll.u32 %s461_s30, 1  ;;  %s2424_s30 = smov 47  }
  0x25   : > { %s463_s24 = scalar_lea.vmem %s2446_s3, %s1642_s12  ;;  %v533_v16 = vrot.slane %v503_v12, %v2109_v8  ;;  %v508_v17 = vrot.slane %v503_v12, %v2111_v9  ;;  %s2430_s12 = smov 33  }
  0x26   : > { %v2122_v15 = vld [vmem:[%s463_s24] sm:$0xf]  ;;  %s1940_s24 = smov 31   ;;  %s2457_s3 = smov 47  }
  0x27   : > { %v536_v18 = vcombine.low %v529_v13, %v533_v16  ;;  %v511_v19 = vcombine.low %v501_v14, %v508_v17  ;;  %v597_v20 = vrot.slane %v2122_v15, %v2099_v6  ;;  %v673_v23 = vcombine.low %v2122_v15, %v2122_v15 }
  0x29   : > { %v543_v21 = vrot.slane %v536_v18, %v2099_v6  ;;  %v518_v22 = vrot.slane %v511_v19, %v2099_v6  ;;  %v600_v24 = vshrl.u32 %v597_v20, 16  ;;  %v603_v25 = vshll.u32 %v597_v20, 16 }
  0x2a   : > { %v598_v26 = vcombine.high %v597_v20, %v597_v20  ;;  %v680_v27 = vrot.slane %v673_v23, %v2099_v6 }
  0x2b   : > { %544 = vrot.lane.b32.xlu1 %v543_v21, %s2423_s8  ;;  %551 = vrot.lane.b32.xlu0 %v518_v22, %s1940_s24  ;;  %v602_v28 = vrot.slane %v600_v24, 6  ;;  %v605_v29 = vrot.slane %v603_v25, 7  ;;  %v741_v36 = vrot.slane %v600_v24, 5  ;;  %s1945_s8 = smov 15   ;;  %v742_v40 = vrot.slane %v603_v25, 6 }
  0x2c   : > { %v608_v30 = vshrl.u32 %v598_v26, 16  ;;  %v611_v31 = vshll.u32 %v598_v26, 16  ;;  %v681_v35 = vcombine.low %v680_v27, %v680_v27 }
  0x2d   : > { %v606_v32 = vor.u32 %v605_v29, %v602_v28  ;;  %v743_v42 = vor.u32 %v742_v40, %v741_v36 }
  0x2e   : > { %v610_v33 = vrot.slane %v608_v30, 6  ;;  %v613_v34 = vrot.slane %v611_v31, 7  ;;  %v744_v38 = vrot.slane %v608_v30, 5  ;;  %v745_v39 = vrot.slane %v611_v31, 6 }
  0x2f   : > { %565 = vrot.lane.b32.xlu1 %v518_v22, %s2424_s30  ;;  %558 = vrot.lane.b32.xlu0 %v543_v21, %s2430_s12  ;;  %s1946_s30 = smov 127   ;;  %s1951_s12 = smov 110  }
  0x30   : > { %v614_v37 = vor.u32 %v613_v34, %v610_v33  ;;  %v746_v41 = vor.u32 %v745_v39, %v744_v38 }
  0x33   : > { %572 = vrot.lane.b32.xlu0 %v543_v21, %s2425_s21  ;;  %684 = vrot.lane.b32.xlu1 %v680_v27, %s2428_s29  ;;  %s2426_s21 = smov 95  }
  0x37   : > { %519 = vrot.lane.b32.xlu1 %v518_v22, %s1945_s8  ;;  %615 = vrot.lane.b32.xlu0 %v606_v32, %s1946_s30 }
  0x3b   : > { %682 = vrot.lane.b32.xlu0 %v681_v35, %s2428_s29  ;;  %617 = vrot.lane.b32.xlu1 %v614_v37, %s1946_s30  ;;  %s1948_s30 = smov 126   ;;  %s2433_s29 = smov 112  }
  0x3f   : > { %749 = vrot.lane.b32.xlu0 %v746_v41, %s2426_s21  ;;  %747 = vrot.lane.b32.xlu1 %v743_v42, %s2426_s21  ;;  %s2431_s21 = smov 96  }
  0x9d   : > { %v545_v43 = vpop.permute.xlu1 %544  ;;  %v552_v44 = vpop.permute.xlu0 %551 }
  0x9e   : > { %v546_v45 = vrot.slane %v545_v43, 6  ;;  %v553_v46 = vrot.slane %v552_v44, 6 }
  0xa0   : > { %v548_v47 = vsel %vm547_vm0, %v546_v45, %v545_v43  ;;  %v555_v48 = vsel %vm554_vm1, %v553_v46, %v552_v44  ;;  %vm2163_vm0 = vmand %vm770_vm8, %vm771_vm9  ;;  %vm669_vm1 = vcmask 916480   ;;  %vm813_vm9 = vsmask.f32 2304 }
  0xa1   : > { %v550_v49 = vmul.bf16 %v548_v47, %v2122_v15  ;;  %v557_v50 = vmul.bf16 %v555_v48, %v2122_v15  ;;  %v566_v51 = vpop.permute.xlu1 %565  ;;  %v559_v52 = vpop.permute.xlu0 %558 }
  0xa2   : > { %v567_v53 = vrot.slane %v566_v51, 6  ;;  %v560_v54 = vrot.slane %v559_v52, 6 }
  0xa3   : > { %v630_v55 = vrot.slane %v550_v49, %v2099_v6  ;;  %v647_v56 = vrot.slane %v557_v50, %v2099_v6 }
  0xa4   : > { %v569_v57 = vsel %vm568_vm2, %v567_v53, %v566_v51  ;;  %v562_v58 = vsel %vm561_vm3, %v560_v54, %v559_v52  ;;  %vm798_vm2 = vcmask 1047552   ;;  %vm799_vm3 = vsmask.f32 7424 }
  0xa5   : > { %v571_v59 = vmul.bf16 %v569_v57, %v2122_v15  ;;  %v564_v60 = vmul.bf16 %v562_v58, %v2122_v15  ;;  %v632_v61 = vrot.slane %v630_v55, 5  ;;  %v573_v62 = vpop.permute.xlu0 %572  ;;  %v650_v1 = vshrl.u32 %v647_v56, 16  ;;  %v685_v37 = vpop.permute.xlu1 %684  ;;  %vm2179_vm8 = vmand %vm798_vm2, %vm799_vm3 }
  0xa6   : > { %v653_v2 = vshll.u32 %v647_v56, 16  ;;  %v631_v3 = vcombine.high %v630_v55, %v630_v55  ;;  %v574_v4 = vrot.slane %v573_v62, 6  ;;  %v648_v12 = vcombine.high %v647_v56, %v647_v56 }
  0xa7   : > { %v731_v63 = vrot.slane %v571_v59, %v2099_v6  ;;  %v695_v0 = vrot.slane %v564_v60, %v2099_v6  ;;  %634 = vrot.lane.b32.xlu0 %v632_v61, %s1948_s30  ;;  %v652_v16 = vrot.slane %v650_v1, 3  ;;  %vm843_vm2 = vcmask 924672  }
  0xa8   : > { %v655_v17 = vrot.slane %v653_v2, 4  ;;  %v633_v18 = vrot.slane %v631_v3, 5  ;;  %v576_v19 = vsel %vm575_vm4, %v574_v4, %v573_v62  ;;  %v658_v23 = vshrl.u32 %v648_v12, 16  ;;  %vm2169_vm4 = vmand %vm784_vm11, %vm785_vm12 }
  0xa9   : > { %v733_v7 = vrot.slane %v731_v63, 7  ;;  %v732_v10 = vcombine.high %v731_v63, %v731_v63  ;;  %v698_v11 = vshll.u32 %v695_v0, 16  ;;  %v696_v13 = vcombine.high %v695_v0, %v695_v0  ;;  %v616_v38 = vpop.permute.xlu0 %615  ;;  %v520_v39 = vpop.permute.xlu1 %519  ;;  %vm2199_vm12 = vmand %vm775_vm15, %vm813_vm9 }
  0xaa   : > { %v705_v22 = vshrl.u32 %v695_v0, 16  ;;  %v661_v24 = vshll.u32 %v648_v12, 16  ;;  %v578_v25 = vmul.bf16 %v576_v19, %v2122_v15  ;;  %v656_v26 = vor.u32 %v655_v17, %v652_v16 }
  0xab   : > { %735 = vrot.lane.b32.xlu1 %v733_v7, %s2431_s21  ;;  %v734_v14 = vrot.slane %v732_v10, 7  ;;  %v702_v20 = vshll.u32 %v696_v13, 16  ;;  %v700_v21 = vrot.slane %v698_v11, 1  ;;  %v660_v29 = vrot.slane %v658_v23, 3 }
  0xac   : > { %v663_v30 = vrot.slane %v661_v24, 4  ;;  %v762_v31 = vrot.slane %v578_v25, %v2099_v6  ;;  %v708_v33 = vshrl.u32 %v696_v13, 16  ;;  %v521_v43 = vrot.slane %v520_v39, 6 }
  0xad   : > { %737 = vrot.lane.b32.xlu0 %v734_v14, %s2431_s21  ;;  %v704_v27 = vrot.slane %v702_v20, 1  ;;  %v707_v28 = vor.u32 %v705_v22, %v700_v21  ;;  %v683_v40 = vpop.permute.xlu0 %682  ;;  %v618_v41 = vpop.permute.xlu1 %617  ;;  %v1953_v2 = vmov 0   ;;  %v921_v23 = vpack.i.b16 %v2094_v5, %v2094_v5  ;;  %s2462_s21 = smov 112  }
  0xae   : > { %v664_v34 = vor.u32 %v663_v30, %v660_v29  ;;  %v763_v36 = vcombine.low %v762_v31, %v762_v31  ;;  %v523_v45 = vsel %vm522_vm5, %v521_v43, %v520_v39  ;;  %vm719_vm5 = vcmask 900096   ;;  %893 = vmatprep.mubr.bf16.mxu0 %v1953_v2  ;;  %1839 = vset.pattern.permute.xlu1 %v1953_v2 }
  0xaf   : > { %636 = vrot.lane.b32.xlu1 %v633_v18, %s1948_s30  ;;  %v1834_v32 = vpack.i.bf16 %v704_v27, %v700_v21  ;;  %v710_v35 = vor.u32 %v708_v33, %v704_v27  ;;  %s1952_s30 = smov 94   ;;  %v525_v48 = vmul.bf16 %v523_v45, %v2122_v15  ;;  %v620_v15 = vsel %vm619_vm7, %v616_v38, %v618_v41  ;;  %v824_v45 = vld [vmem:[%s2460_s4] sm:$0xf]  ;;  %s454_s4 = scalar_lea.vmem %s2412_s2, %s2105_s28 }
  0xb0   : > { %vm803_vm7 = vcmask 1040384   ;;  %1840 = vset.pattern.permute.xlu0 %v1953_v2  ;;  %v1046_v33 = vrot.slane %v921_v23, %v2109_v8  ;;  %v477_v20 = vld [vmem:[%s454_s4] sm:$0xf]  ;;  %vm943_vm3 = vcmask 64512   ;;  %s1663_s4 = sshll.u32 %s1924_s17, 1 }
  0xb1   : > { %665 = vrot.lane.b32.xlu0 %v656_v26, %s2433_s29  ;;  %v2157_v42 = vpop.permute.xlu0 %749  ;;  %v2159_v44 = vpop.permute.xlu1 %747  ;;  %v586_v51 = vrot.slane %v525_v48, %v2099_v6  ;;  %v687_v6 = vsel %vm686_vm6, %v683_v40, %v685_v37 }
  0xb3   : > { %715 = vrot.lane.b32.xlu1 %v707_v28, %s1951_s12  ;;  %v587_v53 = vcombine.high %v586_v51, %v586_v51  ;;  %v773_v62 = vsel %vm2163_vm0, %v586_v51, %v620_v15 }
  0xb5   : > { %1835 = vrot.lane.b32.xlu0 %v1834_v32, %s1951_s12  ;;  %v774_v59 = vsel %vm2163_vm0, %v587_v53, %v618_v41  ;;  %vm817_vm0 = vcmask 1043456   ;;  %v825_v32 = vld [vmem:[%s2415_s5] sm:$0xff] }
  0xb7   : > { %667 = vrot.lane.b32.xlu1 %v664_v34, %s2433_s29  ;;  %s2456_s29 = smov 17   ;;  %v1955_v34 = vmov 65535  }
  0xb9   : > { %717 = vrot.lane.b32.xlu0 %v710_v35, %s1951_s12  ;;  %s1954_s12 = smov 113   ;;  %v853_v35 = vsel %vm784_vm11, 4294967295, %v1955_v34  ;;  %vm848_vm11 = vcmask 220160   ;;  %v933_v34 = vld [vmem:[%s2416_s6] sm:$0xf] }
  0xba   : > { %v854_v39 = vsel %vm789_vm13, %v853_v35, 0  ;;  %v1648_v35 = vld [vmem:[%s2416_s6 + $0x8] sm:$0xf] }
  0xbb   : > { %764 = vrot.lane.b32.xlu1 %v763_v36, %s1952_s30 }
  0xbd   : > { %766 = vrot.lane.b32.xlu0 %v762_v31, %s1952_s30  ;;  %v926_v31 = vrot.slane %v921_v23, %v2111_v9  ;;  %s2463_s30 = smov 111  }
 0x119   : > { %v635_v46 = vpop.permute.xlu0 %634 }
 0x11d   : > { %v736_v47 = vpop.permute.xlu1 %735 }
 0x11f   : > { %v738_v49 = vpop.permute.xlu0 %737 }
 0x120   : > { %v740_v10 = vsel %vm739_vm14, %v736_v47, %v738_v49 }
 0x121   : > { %v637_v50 = vpop.permute.xlu1 %636 }
 0x122   : > { %v639_v56 = vsel %vm638_vm10, %v635_v46, %v637_v50  ;;  %v782_v63 = vsel %vm775_vm15, %v774_v59, %v637_v50  ;;  %vm768_vm10 = vcmask 769024   ;;  %v1956_v46 = vmov 0.0  }
 0x123   : > { %v666_v52 = vpop.permute.xlu0 %665  ;;  %v778_v3 = vsel %vm775_vm15, %v773_v62, %v639_v56  ;;  %vm2455_vm15 = vcmask 777216   ;;  %1685 = vmatprep.subr.bf16.mxu1 %v1956_v46 }
 0x124   : > { %v752_v24 = vsel %vm2455_vm15, %v2159_v44, %v2157_v42 }
 0x125   : > { %v716_v54 = vpop.permute.xlu1 %715 }
 0x127   : > { %v1836_v57 = vpop.permute.xlu0 %1835 }
 0x128   : > { %v1838_v60 = vunpack.i.h.bf16 %v1836_v57  ;;  %v1837_v61 = vunpack.i.l.bf16 %v1836_v57 }
 0x129   : > { %v668_v0 = vpop.permute.xlu1 %667 }
 0x12a   : > { %v670_v4 = vsel %vm669_vm1, %v666_v52, %v668_v0  ;;  %v788_v7 = vsel %vm2169_vm4, %v782_v63, %v668_v0  ;;  %v720_v14 = vsel %vm719_vm5, %v1837_v61, %v1838_v60 }
 0x12b   : > { %v787_v11 = vsel %vm2169_vm4, %v778_v3, %v670_v4  ;;  %v718_v12 = vpop.permute.xlu0 %717  ;;  %v796_v13 = vsel %vm789_vm13, %v788_v7, %v685_v37  ;;  %vm1354_vm4 = vcmask 654336  }
 0x12c   : > { %v721_v16 = vsel %vm719_vm5, %v716_v54, %v718_v12  ;;  %v810_v17 = vsel %vm803_vm7, %v718_v12, %v738_v49  ;;  %v802_v18 = vsel %vm2179_vm8, %v796_v13, %v1838_v60  ;;  %v792_v19 = vsel %vm789_vm13, %v787_v11, %v687_v6 }
 0x12d   : > { %v806_v21 = vsel %vm803_vm7, %v721_v16, %v740_v10  ;;  %837 = vrot.lane.b32.xlu0 %v802_v18, %s1954_s12  ;;  %v801_v22 = vsel %vm2179_vm8, %v792_v19, %v720_v14  ;;  %v765_v25 = vpop.permute.xlu1 %764  ;;  %v816_v27 = vsel %vm2199_vm12, %v810_v17, %v2157_v42  ;;  %vm1957_vm13 = vmmov 0   ;;  %v1465_v19 = vld [vmem:[%s2417_s7] sm:$0xff] }
 0x12e   : > { %835 = vrot.lane.b32.xlu1 %v801_v22, %s1954_s12  ;;  %v815_v30 = vsel %vm2199_vm12, %v806_v21, %v752_v24  ;;  %1687 = vmatprep.mubr.msk.bf16.mxu1 %vm1957_vm13, %v1956_v46  ;;  %vm1416_vm5 = vcmask 646144  }
 0x12f   : > { %v767_v26 = vpop.permute.xlu0 %766 }
 0x130   : > { %v769_v28 = vsel %vm768_vm10, %v765_v25, %v767_v26  ;;  %v823_v29 = vsel %vm817_vm0, %v816_v27, %v767_v26  ;;  %v1645_v26 = vld [vmem:[%s2416_s6 + $0x4] sm:$0xf] }
 0x131   : > { %841 = vrot.lane.b32.xlu0 %v823_v29, %s1954_s12  ;;  %v820_v5 = vsel %vm817_vm0, %v815_v30, %v769_v28 }
 0x132   : > { %839 = vrot.lane.b32.xlu1 %v820_v5, %s1954_s12 }
 0x135   : > { %928 = vrot.lane.b32.xlu0 %v926_v31, %s1945_s8 }
 0x136   : > { %828 = vperm.xlu1 %1839, %v825_v32  }
 0x139   : > { %1109 = vrot.lane.b32.xlu0 %v926_v31, %s1940_s24 }
 0x13a   : > { %1048 = vrot.lane.b32.xlu1 %v1046_v33, %s2456_s29  ;;  %s1960_s29 = smov 80  }
 0x13d   : > { %1286 = vrot.lane.b32.xlu0 %v926_v31, %s2457_s3  ;;  %s1958_s3 = smov 97  }
 0x13e   : > { %1225 = vrot.lane.b32.xlu1 %v1046_v33, %s2458_s23  ;;  %s2461_s23 = sshll.u32 %s2102_s25, 1 }
 0x13f   : > { %s467_s24 = scalar_lea.vmem %s2419_s9, %s2461_s23  ;;  %s1959_s23 = smov 81  }
 0x140   : > { %v904_v47 = vld [vmem:[%s467_s24] sm:$0x3] }
 0x141   : > { %v909_v51 = vrot.slane %v904_v47, %v2111_v9  ;;  %v913_v54 = vrot.slane %v904_v47, %v2109_v8 }
 0x142   : > { %1403 = vrot.lane.b32.xlu1 %v1046_v33, %s2459_s19  ;;  %s2464_s19 = smov 96  }
 0x19f   : > { %v838_v36 = vpop.permute.xlu0 %837 }
 0x1a0   : > { %861 = vmatprep.subr.bf16.mxu0 %v838_v36  ;;  %v836_v37 = vpop.permute.xlu1 %835 }
 0x1a1   : > { %v844_v38 = vsel %vm843_vm2, %v836_v37, %v838_v36 }
 0x1a2   : > { %862 = vmatpush1.bf16.msra.mxu0 %v844_v38 }
 0x1a3   : > { %v842_v40 = vpop.permute.xlu0 %841 }
 0x1a4   : > { %v859_v41 = vand.u32 %v854_v39, %v842_v40  ;;  %v840_v42 = vpop.permute.xlu1 %839 }
 0x1a5   : > { %v845_v43 = vsel %vm843_vm2, %v840_v42, %v842_v40 }
 0x1a6   : > { %v856_v44 = vand.u32 %v854_v39, %v845_v43  ;;  %863 = vmatprep.subr.bf16.mxu0 %v859_v41 }
 0x1a7   : > { %v929_v9 = vpop.permute.xlu0 %928 }
 0x1a8   : > { %864 = vmatpush1.bf16.msra.mxu0 %v856_v44  ;;  %v1650_v44 = vld [vmem:[%s2416_s6 + $0xc] sm:$0xf] }
 0x1a9   : > { %1697 = vmatprep.subr.bf16.mxu0 %v1956_v46 }
 0x1ab   : > { %1644 = vmatmul.mubr.msk.bf16.vlgmr.msra.gmra.mrb[0].mxu0 %vm848_vm11, %v824_v45  ;;  %v1110_v1 = vpop.permute.xlu0 %1109  ;;  %v1652_v45 = vld [vmem:[%s2416_s6 + $0x10] sm:$0xf] }
 0x1ac   : > { %1699 = vmatprep.mubr.msk.bf16.mxu0 %vm1957_vm13, %v1956_v46 }
 0x1af   : > { %v1287_v11 = vpop.permute.xlu0 %1286 }
 0x1b5   : > { %v829_v48 = vpop.permute.xlu1 %828 }
 0x1b9   : > { %v1049_v62 = vpop.permute.xlu1 %1048 }
 0x1bd   : > { %v1226_v4 = vpop.permute.xlu1 %1225 }
 0x1c1   : > { %v1404_v14 = vpop.permute.xlu1 %1403 }
 0x27e   : > { %v895_v49 = vpop.f32.mrb[0].mxu0 }
 0x27f   : > { %v896_v50 = vadd.f32 %v895_v49, %v829_v48  ;;  %v897_v52 = vpop.f32.mrb[1].mxu0 }
 0x280   : > { %v898_v53 = vadd.f32 %v897_v52, %v829_v48  ;;  %v899_v55 = vpop.f32.mrb[2].mxu0 }
 0x281   : > { %v902_v15 = vmax.f32 %v896_v50, 0.0  ;;  %v900_v6 = vpop.f32.mrb[3].mxu0  ;;  %v1654_v55 = vld [vmem:[%s2416_s6 + $0x14] sm:$0xf] }
 0x282   : > { %v903_v56 = vmax.f32 %v898_v53, 0.0 }
 0x283   : > { %v916_v57 = vmul.f32 %v909_v51, %v902_v15  ;;  %v1656_v15 = vld [vmem:[%s2416_s6 + $0x18] sm:$0xf] }
 0x284   : > { %v917_v58 = vmul.f32 %v913_v54, %v903_v56 }
 0x285   : > { %v918_v59 = vpack.c.bf16 %v916_v57, %v916_v57 }
 0x286   : > { %v919_v60 = vpack.c.bf16 %v917_v58, %v917_v58 }
 0x287   : > { %938 = vrot.lane.b32.xlu0 %v918_v59, %s2462_s21  ;;  %v931_v8 = vmul.bf16 %v929_v9, %v918_v59  ;;  %v1051_v63 = vmul.bf16 %v1049_v62, %v918_v59  ;;  %v1112_v2 = vmul.bf16 %v1110_v1, %v918_v59  ;;  %v1228_v7 = vmul.bf16 %v1226_v4, %v918_v59 }
 0x288   : > { %940 = vrot.lane.b32.xlu1 %v919_v60, %s2462_s21  ;;  %v932_v61 = vmul.bf16 %v929_v9, %v919_v60  ;;  %v1052_v0 = vmul.bf16 %v1049_v62, %v919_v60  ;;  %v1113_v3 = vmul.bf16 %v1110_v1, %v919_v60  ;;  %v1229_v10 = vmul.bf16 %v1226_v4, %v919_v60  ;;  %s450_s21 = scalar_lea.vmem %s2411_s1, %s2105_s28  ;;  %s1491_s28 = sadd.s32 %s1920_s16, %s1663_s4 }
 0x289   : > { %v1289_v12 = vmul.bf16 %v1287_v11, %v918_v59  ;;  %v1290_v13 = vmul.bf16 %v1287_v11, %v919_v60  ;;  %v1406_v16 = vmul.bf16 %v1404_v14, %v918_v59  ;;  %v1407_v17 = vmul.bf16 %v1404_v14, %v919_v60  ;;  %v470_v18 = vld [vmem:[%s450_s21] sm:$0xf]  ;;  %s1664_s24 = sshll.u32 %s1491_s28, 6 }
 0x28a   : > { %s2357_s17 = scalar_lea.hbm %s2420_s10, %s1664_s24 }
 0x28b   : > { %992 = vrot.lane.b32.xlu0 %v931_v8, %s1954_s12  ;;  %v1658_v8 = vld [vmem:[%s2416_s6 + $0x1c] sm:$0xf] }
 0x28c   : > { %994 = vrot.lane.b32.xlu1 %v932_v61, %s1954_s12  ;;  %s2465_s12 = smov 95   ;;  %v1660_v61 = vld [vmem:[%s2416_s6 + $0x20] sm:$0xf] }
 0x28f   : > { %1057 = vrot.lane.b32.xlu0 %v1051_v63, %s2463_s30 }
 0x290   : > { %1059 = vrot.lane.b32.xlu1 %v1052_v0, %s2463_s30  ;;  %s1961_s30 = smov 79  }
 0x293   : > { %1118 = vrot.lane.b32.xlu0 %v1112_v2, %s1958_s3 }
 0x294   : > { %1120 = vrot.lane.b32.xlu1 %v1113_v3, %s1958_s3  ;;  %s1636_s3 = sshll.u32 %s2097_s22, 1  ;;  %s436_s22 = sand.u32 1, %s1912_s14  }
 0x295   : > { %s1480_s16 = scalar_lea.sflag [#allocation3], %s436_s22 }
 0x297   : > { %1173 = vrot.lane.b32.xlu0 %v918_v59, %s2464_s19 }
 0x298   : > { %1175 = vrot.lane.b32.xlu1 %v919_v60, %s2464_s19  ;;  %s444_s19 = sadd.s32 %s1636_s3, %s2102_s25  ;;  %s1635_s25 = sshll.u32 %s436_s22, 2 }
 0x299   : > { %s438_s21 = scalar_lea.vmem [#allocation2], %s1635_s25 }
 0x29b   : > { %1234 = vrot.lane.b32.xlu0 %v1228_v7, %s2465_s12 }
 0x29c   : > { %1236 = vrot.lane.b32.xlu1 %v1229_v10, %s2465_s12  ;;  %s1637_s12 = sshll.u32 %s444_s19, 2 }
 0x29d   : > { %s446_s8 = scalar_lea.vmem %s2410_s0, %s1637_s12 }
 0x29f   : > { %1295 = vrot.lane.b32.xlu0 %v1289_v12, %s1959_s23 }
 0x2a0   : > { %1297 = vrot.lane.b32.xlu1 %v1290_v13, %s1959_s23  ;;  %s1962_s23 = smov [#allocation2]  }
 0x2a3   : > { %1350 = vrot.lane.b32.xlu0 %v918_v59, %s1960_s29 }
 0x2a4   : > { %1352 = vrot.lane.b32.xlu1 %v919_v60, %s1960_s29  ;;  %s1846_s29 = sshll.u32 %s1962_s23, 4  ;;  %s1847_s29 = int_to_ptr.vmem [resolvable:$false] %s1846_s29 }
 0x2a7   : > { %1412 = vrot.lane.b32.xlu0 %v1406_v16, %s1961_s30 }
 0x2a8   : > { %1414 = vrot.lane.b32.xlu1 %v1407_v17, %s1961_s30  ;;  %s1495_s30 = sshll.u32 %s438_s21, 4  ;;  %s2359_s30 = int_to_ptr.vmem [resolvable:$true] %s1495_s30 }
 0x2a9   : > { %s1842_s12 = scalar_lea.vmem %s2359_s30, 64  ;;  %p1849_p4 = scmp.lt.s32.totalorder %s2359_s30, %s1847_s29 }
 0x2aa   : > { %p1843_p0 = scmp.ne.s32.totalorder %s2359_s30, %s1842_s12 }
 0x2ab   : > { %473 = vperm.xlu0 %1840, %v470_v18  }
 0x2ac   : > { %1468 = vperm.xlu1 %1839, %v1465_v19   ;;  %p1844_p1 = pnand %p1843_p0, %p2069_p3 }
 0x2ae   : > { %p1845_p2 = pneg %p1844_p1 }
 0x2b0   : > { %480 = vperm.xlu1 %1839, %v477_v20  }
 0x2f9   : > { %v939_v21 = vpop.permute.xlu0 %938 }
 0x2fa   : > { %v941_v22 = vpop.permute.xlu1 %940 }
 0x2fb   : > { %v942_v23 = vsel %vm669_vm1, %v939_v21, %v941_v22  ;;  %vm1122_vm1 = vcmask 793600  }
 0x2fc   : > { %v948_v24 = vsel %vm817_vm0, %v942_v23, 0 }
 0x2fd   : > { %v993_v25 = vpop.permute.xlu0 %992  ;;  %1686 = vmatpush3.bf16.msra.mxu1 %v948_v24 }
 0x2fe   : > { %v995_v27 = vpop.permute.xlu1 %994  ;;  %1691 = vmatprep.subr.bf16.mxu1 %v1956_v46 }
 0x2ff   : > { %v996_v28 = vsel %vm843_vm2, %v993_v25, %v995_v27 }
 0x300   : > { %v1001_v29 = vsel %vm817_vm0, %v996_v28, 0  ;;  %1688 = vmatmul.mubr.msk.bf16.vlgmr.msra.gmra.mrb[0].mxu1 %vm943_vm3, %v1645_v26 }
 0x301   : > { %v1058_v30 = vpop.permute.xlu0 %1057  ;;  %1692 = vmatpush3.bf16.msra.mxu1 %v1001_v29  ;;  %1693 = vmatprep.mubr.msk.bf16.mxu1 %vm1957_vm13, %v1956_v46 }
 0x302   : > { %v1060_v5 = vpop.permute.xlu1 %1059  ;;  %1703 = vmatprep.subr.bf16.mxu1 %v1956_v46 }
 0x303   : > { %v1061_v31 = vsel %vm686_vm6, %v1058_v30, %v1060_v5  ;;  %vm2466_vm6 = vmmov %vm2455_vm15 }
 0x304   : > { %v1066_v32 = vsel %vm817_vm0, %v1061_v31, 0 }
 0x305   : > { %v1119_v33 = vpop.permute.xlu0 %1118  ;;  %1698 = vmatpush3.bf16.msra.mxu0 %v1066_v32 }
 0x306   : > { %v1121_v36 = vpop.permute.xlu1 %1120  ;;  %1709 = vmatprep.subr.bf16.mxu0 %v1956_v46 }
 0x307   : > { %v1123_v37 = vsel %vm1122_vm1, %v1119_v33, %v1121_v36 }
 0x308   : > { %v1128_v38 = vsel %vm817_vm0, %v1123_v37, 0  ;;  %1694 = vmatmul.mubr.msk.bf16.vlgmr.msra.gmra.mrb[4].mxu1 %vm943_vm3, %v933_v34  ;;  %1700 = vmatmul.mubr.msk.bf16.vlgmr.msra.gmra.mrb[4].mxu0 %vm943_vm3, %v1648_v35  ;;  %v469_v37 = vld [vmem:[%s446_s8] sm:$0xf]  ;;  %s1848_s8 = scalar_lea.vmem %s1847_s29, 128 }
 0x309   : > { %v1174_v39 = vpop.permute.xlu0 %1173  ;;  %1704 = vmatpush3.bf16.msra.mxu1 %v1128_v38  ;;  %1705 = vmatprep.mubr.msk.bf16.mxu1 %vm1957_vm13, %v1956_v46  ;;  %p1850_p5 = scmp.lt.s32.totalorder %s1848_s8, %s1842_s12 }
 0x30a   : > { %v1176_v40 = vpop.permute.xlu1 %1175  ;;  %1715 = vmatprep.subr.bf16.mxu1 %v1956_v46  ;;  %1711 = vmatprep.mubr.msk.bf16.mxu0 %vm1957_vm13, %v1956_v46 }
 0x30b   : > { %v1177_v41 = vsel %vm739_vm14, %v1174_v39, %v1176_v40  ;;  %vm1299_vm14 = vcmask 662528   ;;  %p1851_p6 = por %p1850_p5, %p1849_p4 }
 0x30c   : > { %v1182_v42 = vsel %vm817_vm0, %v1177_v41, 0 }
 0x30d   : > { %v1235_v43 = vpop.permute.xlu0 %1234  ;;  %1710 = vmatpush3.bf16.msra.mxu0 %v1182_v42  ;;  %p1852_p7 = pnand %p1851_p6, %p1845_p2 }
 0x30e   : > { %v1237_v47 = vpop.permute.xlu1 %1236  ;;  %1721 = vmatprep.subr.bf16.mxu0 %v1956_v46 }
 0x30f   : > { %v1238_v48 = vsel %vm2466_vm6, %v1235_v43, %v1237_v47 }
 0x310   : > { %v1243_v49 = vsel %vm817_vm0, %v1238_v48, 0  ;;  %1706 = vmatmul.mubr.msk.bf16.vlgmr.msra.gmra.mrb[8].mxu1 %vm943_vm3, %v1650_v44  ;;  %1712 = vmatmul.mubr.msk.bf16.vlgmr.msra.gmra.mrb[8].mxu0 %vm943_vm3, %v1652_v45 }
 0x311   : > { %v1296_v50 = vpop.permute.xlu0 %1295  ;;  %1716 = vmatpush3.bf16.msra.mxu1 %v1243_v49  ;;  %1717 = vmatprep.mubr.msk.bf16.mxu1 %vm1957_vm13, %v1956_v46 }
 0x312   : > { %v1298_v51 = vpop.permute.xlu1 %1297  ;;  %1727 = vmatprep.subr.bf16.mxu1 %v1956_v46  ;;  %1723 = vmatprep.mubr.msk.bf16.mxu0 %vm1957_vm13, %v1956_v46 }
 0x313   : > { %v1300_v52 = vsel %vm1299_vm14, %v1296_v50, %v1298_v51 }
 0x314   : > { %v1305_v53 = vsel %vm817_vm0, %v1300_v52, 0 }
 0x315   : > { %v1351_v54 = vpop.permute.xlu0 %1350  ;;  %1722 = vmatpush3.bf16.msra.mxu0 %v1305_v53 }
 0x316   : > { %v1353_v6 = vpop.permute.xlu1 %1352  ;;  %1733 = vmatprep.subr.bf16.mxu0 %v1956_v46 }
 0x317   : > { %v1355_v56 = vsel %vm1354_vm4, %v1351_v54, %v1353_v6 }
 0x318   : > { %v1360_v57 = vsel %vm817_vm0, %v1355_v56, 0  ;;  %1718 = vmatmul.mubr.msk.bf16.vlgmr.msra.gmra.mrb[12].mxu1 %vm943_vm3, %v1654_v55  ;;  %1724 = vmatmul.mubr.msk.bf16.vlgmr.msra.gmra.mrb[12].mxu0 %vm943_vm3, %v1656_v15 }
 0x319   : > { %v1413_v58 = vpop.permute.xlu0 %1412  ;;  %1728 = vmatpush3.bf16.msra.mxu1 %v1360_v57  ;;  %1729 = vmatprep.mubr.msk.bf16.mxu1 %vm1957_vm13, %v1956_v46 }
 0x31a   : > { %v1415_v59 = vpop.permute.xlu1 %1414  ;;  %1735 = vmatprep.mubr.msk.bf16.mxu0 %vm1957_vm13, %v1956_v46 }
 0x31b   : > { %v1417_v60 = vsel %vm1416_vm5, %v1413_v58, %v1415_v59 }
 0x31c   : > { %v1422_v9 = vsel %vm817_vm0, %v1417_v60, 0 }
 0x31d   : > { %1734 = vmatpush3.bf16.msra.mxu0 %v1422_v9 }
 0x320   : > { %1730 = vmatmul.mubr.msk.bf16.vlgmr.msra.gmra.mrb[16].mxu1 %vm943_vm3, %v1658_v8  ;;  %1736 = vmatmul.mubr.msk.bf16.vlgmr.msra.gmra.mrb[16].mxu0 %vm943_vm3, %v1660_v61 }
 0x32a   : > { %v474_v36 = vpop.permute.xlu0 %473 }
 0x32b   : > { %v1469_v35 = vpop.permute.xlu1 %1468  ;;  %v476_v45 = vsub.f32 %v469_v37, %v474_v36 }
 0x32f   : > { %v481_v50 = vpop.permute.xlu1 %480 }
 0x330   : > { %v483_v52 = vmul.f32 %v481_v50, %v476_v45 }
 0x3d3   : > { %v984_v62 = vpop.f32.mrb[0].mxu1 }
 0x3d4   : > { %v1689_v63 = vpop.f32.mrb[1].mxu1 }
 0x3d5   : > { %v987_v0 = vpop.f32.mrb[2].mxu1 }
 0x3d6   : > { %v1690_v46 = vpop.f32.mrb[3].mxu1 }
 0x3db   : > { %v1037_v1 = vpop.f32.mrb[4].mxu1  ;;  %v1102_v2 = vpop.f32.mrb[4].mxu0 }
 0x3dc   : > { %v1038_v3 = vadd.f32 %v1037_v1, %v984_v62  ;;  %v1695_v4 = vpop.f32.mrb[5].mxu1  ;;  %v1701_v7 = vpop.f32.mrb[5].mxu0 }
 0x3dd   : > { %v1040_v10 = vpop.f32.mrb[6].mxu1  ;;  %v1105_v11 = vpop.f32.mrb[6].mxu0 }
 0x3de   : > { %v1108_v12 = vadd.f32 %v1102_v2, %v1038_v3  ;;  %v1696_v13 = vpop.f32.mrb[7].mxu1  ;;  %v1702_v14 = vpop.f32.mrb[7].mxu0 }
 0x3e3   : > { %v1164_v16 = vpop.f32.mrb[8].mxu1  ;;  %v1218_v17 = vpop.f32.mrb[8].mxu0 }
 0x3e4   : > { %v1170_v18 = vadd.f32 %v1164_v16, %v1108_v12  ;;  %v1707_v19 = vpop.f32.mrb[9].mxu1  ;;  %v1713_v20 = vpop.f32.mrb[9].mxu0 }
 0x3e5   : > { %v1167_v21 = vpop.f32.mrb[10].mxu1  ;;  %v1221_v22 = vpop.f32.mrb[10].mxu0 }
 0x3e6   : > { %v1224_v23 = vadd.f32 %v1218_v17, %v1170_v18  ;;  %v1708_v24 = vpop.f32.mrb[11].mxu1  ;;  %v1714_v25 = vpop.f32.mrb[11].mxu0 }
 0x3eb   : > { %v1279_v26 = vpop.f32.mrb[12].mxu1  ;;  %v1341_v27 = vpop.f32.mrb[12].mxu0 }
 0x3ec   : > { %v1285_v28 = vadd.f32 %v1279_v26, %v1224_v23  ;;  %v1719_v29 = vpop.f32.mrb[13].mxu1  ;;  %v1725_v30 = vpop.f32.mrb[13].mxu0 }
 0x3ed   : > { %v1282_v5 = vpop.f32.mrb[14].mxu1  ;;  %v1344_v31 = vpop.f32.mrb[14].mxu0 }
 0x3ee   : > { %v1347_v32 = vadd.f32 %v1341_v27, %v1285_v28  ;;  %v1720_v33 = vpop.f32.mrb[15].mxu1  ;;  %v1726_v34 = vpop.f32.mrb[15].mxu0 }
 0x3f3   : > { %v1396_v38 = vpop.f32.mrb[16].mxu1  ;;  %v1458_v39 = vpop.f32.mrb[16].mxu0 }
 0x3f4   : > { %v1402_v40 = vadd.f32 %v1396_v38, %v1347_v32  ;;  %v1731_v41 = vpop.f32.mrb[17].mxu1  ;;  %v1737_v42 = vpop.f32.mrb[17].mxu0 }
 0x3f5   : > { %v1399_v43 = vpop.f32.mrb[18].mxu1  ;;  %v1461_v44 = vpop.f32.mrb[18].mxu0 }
 0x3f6   : > { %v1464_v47 = vadd.f32 %v1458_v39, %v1402_v40  ;;  %v1732_v48 = vpop.f32.mrb[19].mxu1  ;;  %v1738_v49 = vpop.f32.mrb[19].mxu0 }
 0x3f8   : > { %v1471_v51 = vadd.f32 %v1469_v35, %v1464_v47 }
 0x3fa   : > { %v1472_v53 = vadd.f32 1.0, %v1471_v51  ;;  %v1475_v55 = vrot.slane %v1471_v51, 4 }
 0x3fc   : > { %v1473_v54 = vmul.f32 %v1472_v53, %v483_v52 }
 0x3fe   : > { %v1477_v15 = vadd.f32 %v1475_v55, %v1473_v54 }
 0x400   : > { %1478 = vst [vmem:[%s438_s21] sm:$0xf] %v1477_v15 }
 0x401   : > { %1855 = shalt.err (!%p1852_p7)
}
 0x402   : > { %s1856_s22 = scalar_lea.hbm %s2357_s17, 64  ;;  %s1860_s28 = scalar_lea.hbm %s2420_s10, 256 }
 0x403   : > { %p1857_p9 = scmp.ne.s32.totalorder %s2357_s17, %s1856_s22  ;;  %p1861_p12 = scmp.lt.u32.totalorder %s2357_s17, %s2420_s10 }
 0x404   : > { %p1862_p13 = scmp.lt.u32.totalorder %s1860_s28, %s1856_s22  ;;  %p1864_p1 = scmp.lt.u32.totalorder %s1856_s22, %s2357_s17 }
 0x405   : > { %p1858_p10 = pnand %p1857_p9, %p2069_p3 }
 0x406   : > { %p1863_p0 = por %p1862_p13, %p1861_p12 }
 0x407   : > { %p1859_p11 = pneg %p1858_p10 }
 0x408   : > { %p1865_p2 = por %p1864_p1, %p1863_p0 }
 0x40a   : > { %p1866_p4 = pnand %p1865_p2, %p1859_p11 }
 0x40c   : > { %1869 = shalt.err (!%p1866_p4)
}
 0x40d   : > { %1739 = dma.vmem_to_hbm [thread:$0]  (%p2069_p3), %s2359_s30, 64, %s2357_s17, %s1480_s16  }
 0x40e PF: > { %p1745_p5 = scmp.ge.s32.totalorder %s1936_s20, 2  ;;  %s1507_s3 = sand.u32 1, %s1908_s13  }
 0x40f   : > { %s1508_s19 = scalar_lea.sflag [#allocation3], %s1507_s3 }
 0x410   : > { %p1742_p6 = pnand %p1745_p5, %p2078_p8 }
 0x412   : > { %1903 = dma.done.wait (!%p1742_p6), %s1508_s19, 64  }
 0x413   : > { %1905 = vsyncadd (!%p1742_p6), %s1508_s19, 4294967232  ;;  %s23_s20 = sadd.s32 1, %s1936_s20   ;;  %s2467_s17 = sld [smem:[#allocation5_spill]] }
 0x414   : > { %p20_p7 = scmp.ge.s32.totalorder %s23_s20, 6   ;;  %s2468_s26 = sld [smem:[#allocation6_spill]] }
 0x415   : > { %s2469_s19 = sld [smem:[#allocation7_spill]]  ;;  %s2470_s13 = smov %s1912_s14 }
 0x416   : > { %s2471_s14 = smov %s1916_s15  ;;  %s2472_s15 = smov %s2087_s11 }
 0x417   : > { %s2473_s16 = smov %s1928_s18  ;;  %22 = sbr.rel (!%p20_p7) target bundleno = 9 (0x9), region = 115 }
 0x41a   : > { %s2474_s18 = smov %s2468_s26 }
 0x41e   :  { %1513 = vsyncpa [#allocation3], 1 }
 0x41f   :  { %1515 = vsyncpa [#allocation3 + $0x1], 1 }

</bundles_post_ra>
